<compile_context>
chip_gen: v7x
topology: tpu7x:2x2x1
jax: 0.10.0
libtpu: 0.0.40
codegen_flags: <defaults>
</compile_context>

<pallas_src>
import functools

import jax
import jax.numpy as jnp
from jax.experimental import pallas as pl
from jax.experimental.pallas import tpu as pltpu


# ----------------------------------------------------------------------------
# Pallas kernel: one-hot MXU gather for one tile of labels
# ----------------------------------------------------------------------------
def _embed_kernel(n_valid_rows, labels_ref, table_ref, out_ref):
    """out = one_hot(labels) @ table  for one (tile_b, cond) output tile.

    labels_ref : (tile_b, 1) int32, VMEM
    table_ref  : (rows_pad, cond), VMEM-resident across all grid steps
    out_ref    : (tile_b, cond)
    """
    labels = labels_ref[...]                                   # (tile_b, 1)
    labels = jnp.clip(labels, 0, n_valid_rows - 1)             # guard OOB labels
    tile_b = labels.shape[0]
    rows_pad = table_ref.shape[0]

    # One-hot selection matrix built on the VPU: (tile_b, rows_pad).
    col_ids = jax.lax.broadcasted_iota(jnp.int32, (tile_b, rows_pad), 1)
    one_hot = (col_ids == labels).astype(table_ref.dtype)

    # Single MXU matmul per tile; f32 accumulation, dense lane-aligned store.
    out_ref[...] = jnp.dot(
        one_hot, table_ref[...], preferred_element_type=jnp.float32
    ).astype(out_ref.dtype)


# ----------------------------------------------------------------------------
# Wrapper
# ----------------------------------------------------------------------------
def label_embedder_forward(embedding_table, labels, *, tile_b=256):
    """embeddings = embedding_table[labels]   (PyTorch nn.Embedding lookup).

    `labels` may have any shape; output has shape labels.shape + (cond_size,).
    """
    n_rows, cond = embedding_table.shape
    lead_shape = labels.shape

    flat = labels.reshape(-1).astype(jnp.int32)
    n = flat.shape[0]

    # Choose a tile that is a multiple of 8 sublanes and no bigger than the
    # padded batch (small batches -> one fat grid step, no per-step overhead).
    n_pad8 = max(8, ((n + 7) // 8) * 8)
    tile_b = min(((tile_b + 7) // 8) * 8, n_pad8)
    n_pad = ((n + tile_b - 1) // tile_b) * tile_b

    # Padded labels point at row 0 (valid); padded rows are sliced off below.
    flat = jnp.pad(flat, (0, n_pad - n)).reshape(n_pad, 1)

    # Pad the MXU contraction dim (table rows) to a multiple of 128.
    rows_pad = ((n_rows + 127) // 128) * 128
    table_p = jnp.pad(embedding_table, ((0, rows_pad - n_rows), (0, 0)))

    grid = (n_pad // tile_b,)

    out = pl.pallas_call(
        functools.partial(_embed_kernel, n_rows),
        out_shape=jax.ShapeDtypeStruct((n_pad, cond), embedding_table.dtype),
        grid_spec=pltpu.PrefetchScalarGridSpec(
            num_scalar_prefetch=0,
            grid=grid,
            in_specs=[
                # per-tile label vector, lands in VMEM/vregs
                pl.BlockSpec((tile_b, 1), lambda i: (i, 0)),
                # whole (padded) table, constant block index -> VMEM-resident
                pl.BlockSpec((rows_pad, cond), lambda i: (0, 0)),
            ],
            out_specs=pl.BlockSpec((tile_b, cond), lambda i: (i, 0)),
        ),
        compiler_params=pltpu.CompilerParams(
            # Lets v7x shard output tiles across its 2 TensorCores at large
            # batch; for grid=(1,) (small batch) it is a no-op.
            dimension_semantics=("parallel",)),
    )(flat, table_p)

    if n_pad != n:
        out = out[:n]
    return out.reshape(*lead_shape, cond)


# ----------------------------------------------------------------------------
if __name__ == "__main__":
    key = jax.random.PRNGKey(0)
    k_tab, k_lbl = jax.random.split(key)

    num_classes = 32          # table has num_classes + 1 rows (CFG null token)
    cond_size = 128           # lane-dense last dim (multiple of 128)
    B = 2

    embedding_table = 0.02 * jax.random.normal(
        k_tab, (num_classes + 1, cond_size), jnp.float32)
    labels = jax.random.randint(k_lbl, (B,), 0, num_classes + 1, dtype=jnp.int32)

    emb = label_embedder_forward(embedding_table, labels)
    jax.block_until_ready(emb)

    ref = jnp.take(embedding_table, labels, axis=0)
    assert emb.shape == (B, cond_size), emb.shape
    assert bool(jnp.all(jnp.isfinite(emb)))
    assert bool(jnp.allclose(emb, ref, rtol=1e-6, atol=1e-6)), \
        "mismatch vs reference embedding gather"
    print("KERNEL_OK")
</pallas_src>

<mosaic_0001>
module attributes {stable_mosaic.version = 11 : i64} {
  func.func @_embed_kernel(%arg0: i32, %arg1: memref<8x1xi32, #tpu.memory_space<vmem>>, %arg2: memref<128x128xf32, #tpu.memory_space<vmem>>, %arg3: memref<8x128xf32, #tpu.memory_space<vmem>>) attributes {dimension_semantics = [#tpu.dimension_semantics<parallel>], iteration_bounds = array<i64: 1>, scalar_prefetch = 0 : i64, scratch_operands = 0 : i64, tpu.core_type = #tpu.core_type<tc>, window_params = [{transform_indices = @transform_0, window_bounds = array<i64: 8, 1>}, {pipeline_mode = #tpu.pipeline_mode<synchronous>, transform_indices = @transform_1, window_bounds = array<i64: 128, 128>}, {transform_indices = @transform_2, window_bounds = array<i64: 8, 128>}]} {
    %c0 = arith.constant 0 : index
    %c0_0 = arith.constant 0 : index
    %0 = vector.load %arg1[%c0, %c0_0] : memref<8x1xi32, #tpu.memory_space<vmem>>, vector<8x1xi32>
    %c0_i32 = arith.constant 0 : i32
    %c32_i32 = arith.constant 32 : i32
    %1 = vector.broadcast %c0_i32 : i32 to vector<8x1xi32>
    %2 = arith.maxsi %1, %0 : vector<8x1xi32>
    %3 = vector.broadcast %c32_i32 : i32 to vector<8x1xi32>
    %4 = arith.minsi %3, %2 : vector<8x1xi32>
    %5 = tpu.iota {dimensions = array<i32: 1>} : vector<8x128xi32>
    %6 = vector.broadcast %4 : vector<8x1xi32> to vector<8x128xi32>
    %7 = arith.cmpi eq, %5, %6 : vector<8x128xi32>
    %8 = arith.extui %7 : vector<8x128xi1> to vector<8x128xi32>
    %9 = arith.sitofp %8 : vector<8x128xi32> to vector<8x128xf32>
    %c0_1 = arith.constant 0 : index
    %c0_2 = arith.constant 0 : index
    %10 = vector.load %arg2[%c0_1, %c0_2] : memref<128x128xf32, #tpu.memory_space<vmem>>, vector<128x128xf32>
    %cst = arith.constant dense<0.000000e+00> : vector<8x128xf32>
    %11 = tpu.matmul %9, %10, %cst {dimension_numbers = #tpu.dot_dimension_numbers<[1], [0], [0], [1], [0, 0, 1, 1], [], []>} : vector<8x128xf32>, vector<128x128xf32>, vector<8x128xf32> -> vector<8x128xf32>
    %c0_3 = arith.constant 0 : index
    %c0_4 = arith.constant 0 : index
    %12 = vector.load %arg3[%c0_3, %c0_4] : memref<8x128xf32, #tpu.memory_space<vmem>>, vector<8x128xf32>
    tpu.vector_store %arg3[%c0_3, %c0_4], %11 {strides = array<i32>} : memref<8x128xf32, #tpu.memory_space<vmem>>, vector<8x128xf32>,
    return
  }
  func.func @transform_0(%arg0: i32) -> (i32, i32) {
    %c0_i32 = arith.constant 0 : i32
    %c0_i32_0 = arith.constant 0 : i32
    return %arg0, %c0_i32 : i32, i32
  }
  func.func @transform_1(%arg0: i32) -> (i32, i32) {
    %c0_i32 = arith.constant 0 : i32
    %c0_i32_0 = arith.constant 0 : i32
    %c0_i32_1 = arith.constant 0 : i32
    return %c0_i32, %c0_i32_0 : i32, i32
  }
  func.func @transform_2(%arg0: i32) -> (i32, i32) {
    %c0_i32 = arith.constant 0 : i32
    %c0_i32_0 = arith.constant 0 : i32
    return %arg0, %c0_i32 : i32, i32
  }
}

</mosaic_0001>

<bundles_post_ra>
// kernel: tpu_custom_call.1
= control target key start
LH: loop header
LB: loop body
LE: loop exit
PB: predicated region body
PF: predicated region fallthrough
CT: control target
= control target key end

     0   :  { %7 = vsyncpa [#allocation3], 0  ;;  %s328_s0 = inlined_call_operand.vmem [shape: s32[8,1], index: 0, kind: input, shape index: {}]   ;;  %s329_s1 = inlined_call_operand.hbm [shape: f32[128,128], index: 1, kind: input, shape index: {}]   ;;  %s330_s2 = inlined_call_operand.hbm [shape: f32[8,128], index: 2, kind: output, shape index: {}]  }
   0x1   :  { %8 = vsyncpa [#allocation4], 0  ;;  %s277_s9 = smov [#allocation2]   ;;  %s229_s13 = scalar_lea.hbm %s329_s1, 2048 }
   0x2   :  { %s16_s10 = sshll.u32 %s277_s9, 4  ;;  %p230_p0 = scmp.ne.s32.totalorder %s329_s1, %s229_s13  ;;  %s17_s10 = int_to_ptr.vmem [resolvable:$true] %s16_s10 }
   0x3   :  { %p233_p1 = scmp.lt.u32.totalorder %s229_s13, %s329_s1 }
   0x5   :  { %p235_p2 = pnand %p233_p1, %p230_p0 }
   0x7   :  { %238 = shalt.err (!%p235_p2)
}
   0x8   :  { %s239_s18 = scalar_lea.vmem %s17_s10, 2048  ;;  %p244_p4 = scmp.lt.s32.totalorder %s17_s10, %s17_s10 }
   0x9   :  { %p240_p3 = scmp.ne.s32.totalorder %s17_s10, %s239_s18  ;;  %p245_p5 = scmp.lt.s32.totalorder %s239_s18, %s239_s18 }
   0xb   :  { %p246_p6 = por %p245_p5, %p244_p4 }
   0xd   :  { %p247_p7 = pnand %p246_p6, %p240_p3 }
   0xf   :  { %250 = shalt.err (!%p247_p7)
}
  0x10   :  { %s278_s19 = smov 128   ;;  %s279_s20 = smov 8  }
  0x11   :  { %22 = dma.hbm_to_vmem [thread:$0]  %s329_s1, 2048, %s17_s10, [#allocation3], %s278_s19, %s278_s19, %s279_s20  }
  0x12   :  { %273 = dma.done.wait [#allocation3], 2048  }
  0x13   :  { %274 = vsyncadd [#allocation3], 4294965248  ;;  %v280_v0 = vmov 0   ;;  %v281_v1 = vmov 0.0|0.0   ;;  %v26_v2 = vld [vmem:[%s328_s0] sm:$0xff]  ;;  %v40_v4 = vld [vmem:[#allocation2 + $0x8] sm:$0xff]  ;;  %v31_v30 = vlaneseq }
  0x14   :  { %228 = vset.pattern.permute.xlu0 %v280_v0  ;;  %195 = vmatprep.subr.bf16.mxu0 %v281_v1  ;;  %v39_v3 = vld [vmem:[#allocation2] sm:$0xff]  ;;  %vm27_vm0 = vcmp.gt.s32.totalorder %v26_v2, 0  ;;  %v41_v6 = vld [vmem:[#allocation2 + $0x10] sm:$0xff]  ;;  %v42_v7 = vld [vmem:[#allocation2 + $0x18] sm:$0xff]  ;;  %vm282_vm2 = vmmov 0   ;;  %v283_v13 = vmov 0.0  }
  0x15   :  { %v196_v5 = vpack.c.bf16 %v40_v4, %v39_v3  ;;  %v28_v8 = vsel %vm27_vm0, %v26_v2, 0  ;;  %v199_v9 = vpack.c.bf16 %v42_v7, %v41_v6  ;;  %v43_v11 = vld [vmem:[#allocation2 + $0x20] sm:$0xff]  ;;  %v44_v12 = vld [vmem:[#allocation2 + $0x28] sm:$0xff]  ;;  %192 = vmatprep.mubr.msk.f32.mxu0 %vm282_vm2, %v283_v13  ;;  %v45_v15 = vld [vmem:[#allocation2 + $0x30] sm:$0xff]  ;;  %v32_v31 = vand.u32 127, %v31_v30  ;;  %s285_s0 = smov [#allocation5]  }
  0x16   :  { %vm29_vm1 = vcmp.lt.s32.totalorder %v28_v8, 32  ;;  %v202_v14 = vpack.c.bf16 %v44_v12, %v43_v11  ;;  %v46_v16 = vld [vmem:[#allocation2 + $0x38] sm:$0xff]  ;;  %v47_v18 = vld [vmem:[#allocation2 + $0x40] sm:$0xff]  ;;  %v48_v19 = vld [vmem:[#allocation2 + $0x48] sm:$0xff]  ;;  %v284_v33 = vmov 1.0   ;;  %s132_s1 = sshll.u32 %s285_s0, 4  ;;  %s133_s1 = int_to_ptr.vmem [resolvable:$true] %s132_s1 }
  0x17   :  { %197 = vmatpush3.bf16.msra.mxu0 %v196_v5  ;;  %v30_v10 = vsel %vm29_vm1, %v28_v8, 32  ;;  %v205_v17 = vpack.c.bf16 %v46_v16, %v45_v15  ;;  %v208_v20 = vpack.c.bf16 %v48_v19, %v47_v18  ;;  %v49_v21 = vld [vmem:[#allocation2 + $0x50] sm:$0xff]  ;;  %v50_v22 = vld [vmem:[#allocation2 + $0x58] sm:$0xff]  ;;  %v51_v24 = vld [vmem:[#allocation2 + $0x60] sm:$0xff]  ;;  %s251_s25 = scalar_lea.vmem %s133_s1, 128  ;;  %p256_p9 = scmp.lt.s32.totalorder %s133_s1, %s133_s1 }
  0x18   :  { %198 = vmatprep.subr.bf16.mxu0 %v281_v1  ;;  %34 = vperm.xlu0 %228, %v30_v10   ;;  %v211_v23 = vpack.c.bf16 %v50_v22, %v49_v21  ;;  %v52_v25 = vld [vmem:[#allocation2 + $0x68] sm:$0xff]  ;;  %v53_v27 = vld [vmem:[#allocation2 + $0x70] sm:$0xff]  ;;  %v54_v28 = vld [vmem:[#allocation2 + $0x78] sm:$0xff]  ;;  %p252_p8 = scmp.ne.s32.totalorder %s133_s1, %s251_s25  ;;  %p257_p10 = scmp.lt.s32.totalorder %s251_s25, %s251_s25 }
  0x19   :  { %v214_v26 = vpack.c.bf16 %v52_v25, %v51_v24  ;;  %v217_v29 = vpack.c.bf16 %v54_v28, %v53_v27 }
  0x1a   :  { %p258_p11 = por %p257_p10, %p256_p9 }
  0x1b   :  { %200 = vmatpush3.bf16.msra.mxu0 %v199_v9 }
  0x1c   :  { %201 = vmatprep.subr.bf16.mxu0 %v281_v1  ;;  %p259_p12 = pnand %p258_p11, %p252_p8 }
  0x1f   :  { %203 = vmatpush3.bf16.msra.mxu0 %v202_v14 }
  0x20   :  { %204 = vmatprep.subr.bf16.mxu0 %v281_v1 }
  0x23   :  { %206 = vmatpush3.bf16.msra.mxu0 %v205_v17 }
  0x24   :  { %207 = vmatprep.subr.bf16.mxu0 %v281_v1 }
  0x27   :  { %209 = vmatpush3.bf16.msra.mxu0 %v208_v20 }
  0x28   :  { %210 = vmatprep.subr.bf16.mxu0 %v281_v1 }
  0x2b   :  { %212 = vmatpush3.bf16.msra.mxu0 %v211_v23 }
  0x2c   :  { %213 = vmatprep.subr.bf16.mxu0 %v281_v1 }
  0x2f   :  { %215 = vmatpush3.bf16.msra.mxu0 %v214_v26 }
  0x30   :  { %216 = vmatprep.subr.bf16.mxu0 %v281_v1 }
  0x33   :  { %218 = vmatpush3.bf16.msra.mxu0 %v217_v29 }
  0x97   :  { %v35_v32 = vpop.permute.xlu0 %34 }
  0x98   :  { %vm36_vm3 = vcmp.eq.s32.totalorder %v32_v31, %v35_v32 }
  0x99   :  { %193 = vmatmul.mubr.msk.f32.vlgmr.msra.gmra.mrb[0].mxu0 %vm36_vm3, %v284_v33 }
 0x16c   :  { %v121_v34 = vpop.f32.mrb[0].mxu0 }
 0x16d   :  { %125 = vst [vmem:[#allocation5] sm:$0xff] %v121_v34  ;;  %v194_v35 = vpop.f32.mrb[1].mxu0 }
 0x16e   :  { %262 = shalt.err (!%p259_p12)
}
 0x16f   :  { %s263_s28 = scalar_lea.hbm %s330_s2, 128 }
 0x170   :  { %p264_p13 = scmp.ne.s32.totalorder %s330_s2, %s263_s28  ;;  %p267_p0 = scmp.lt.u32.totalorder %s263_s28, %s330_s2 }
 0x172   :  { %p269_p1 = pnand %p267_p0, %p264_p13 }
 0x174   :  { %272 = shalt.err (!%p269_p1)
}
 0x175   :  { %135 = dma.vmem_to_hbm [thread:$0]  %s133_s1, 128, %s330_s2, [#allocation4]  }
 0x176   :  { %275 = dma.done.wait [#allocation4], 128  }
 0x177   :  { %276 = vsyncadd [#allocation4], 4294967168 }
 0x178   :  { %139 = vsyncpa [#allocation3], 1 }
 0x179   :  { %140 = vsyncpa [#allocation4], 1 }

</bundles_post_ra>
